<compile_context>
chip_gen: v6e
topology: v6e:2x2x1
jax: 0.10.0
libtpu: 0.0.40
codegen_flags: <defaults>
</compile_context>

<pallas_src>
import math

import jax
import jax.numpy as jnp
from jax.experimental import pallas as pl
from jax.experimental.pallas import tpu as pltpu

_MAX_IN_COLS = 4096                 # cap on input-tile lane width (f32: 16 KiB per row)
_MAX_P_BYTES = 2 * 1024 * 1024      # cap on the constant pooling-matrix tile
_TARGET_X_BYTES = 2 * 1024 * 1024   # target bytes per (double-buffered) input tile


def _pool_matrix(in_cols, out_cols, kernel_size, dtype):
    """(in_cols, out_cols) 0/1 matrix: output column c sums input window [c*k, (c+1)*k).

    Rows >= out_cols * kernel_size stay all-zero, implementing AvgPool1d's
    "discard the remainder" semantics without any wrapper-side slice/copy.
    """
    r = jnp.arange(in_cols, dtype=jnp.int32)
    c = jnp.arange(out_cols, dtype=jnp.int32)
    return ((r[:, None] // kernel_size) == c[None, :]).astype(dtype)


def _make_kernel(inv_k, tl_in, valid_cols, needs_mask):
    """Pooling kernel: lane-dense MXU matmul against the constant pooling matrix."""
    if needs_mask:
        # Edge lane tiles may read past the pooled region (the discarded tail, or the
        # undefined padding of a partial block).  Zero those columns so they cannot
        # contaminate the MXU accumulation (0 * NaN would otherwise propagate).
        def kernel(x_ref, p_ref, o_ref):
            x = x_ref[...]
            col = jax.lax.broadcasted_iota(jnp.int32, x.shape, 1)
            col = col + pl.program_id(1) * tl_in
            x = jnp.where(col < valid_cols, x, jnp.zeros_like(x))
            acc = jnp.dot(x, p_ref[...], preferred_element_type=jnp.float32)
            o_ref[...] = (acc * inv_k).astype(o_ref.dtype)
        return kernel

    def kernel(x_ref, p_ref, o_ref):
        acc = jnp.dot(x_ref[...], p_ref[...], preferred_element_type=jnp.float32)
        o_ref[...] = (acc * inv_k).astype(o_ref.dtype)
    return kernel


def _select_tiling(R, L, L_out, kernel_size, itemsize):
    """Pick (tm, n_row, tl_in, tl_out, n_lane, needs_mask) for a (R, L) -> (R, L_out) pool."""
    valid_cols = L_out * kernel_size

    # ---- lane (last-dim) tiling ----
    if L_out < 128 or (L <= _MAX_IN_COLS and L * L_out * itemsize <= _MAX_P_BYTES):
        # Single lane tile spanning the whole row (block dims == array dims -> always legal,
        # even for tiny/unaligned shapes); the pooling matrix's zero rows absorb the trim.
        tl_in, tl_out, n_lane = L, L_out, 1
    else:
        # Tile pooled columns in multiples of 128 so input and output blocks are lane-dense.
        cap = min(_MAX_IN_COLS // kernel_size,
                  int((_MAX_P_BYTES / (itemsize * kernel_size)) ** 0.5),
                  L_out)
        n_out = max(128, (cap // 128) * 128)
        # Prefer an exact divisor of L_out (no lane overhang, no mask) unless it shrinks
        # the tile too much.
        for d in range(n_out, 127, -128):
            if L_out % d == 0:
                if 4 * d >= n_out:
                    n_out = d
                break
        tl_in, tl_out = n_out * kernel_size, n_out
        n_lane = pl.cdiv(L_out, n_out)

    needs_mask = n_lane * tl_in > valid_cols

    # ---- row (sublane) tiling: ~_TARGET_X_BYTES per input tile, multiples of 8 ----
    target_rows = max(8, min(1024, _TARGET_X_BYTES // max(1, tl_in * itemsize)))
    target_rows -= target_rows % 8
    if R <= target_rows:
        tm, n_row = R, 1          # full row extent: always a legal block dim
    else:
        n_row = pl.cdiv(R, target_rows)
        tm = min(target_rows, ((pl.cdiv(R, n_row) + 7) // 8) * 8)
        n_row = pl.cdiv(R, tm)    # possible small row overhang: OOB writes are dropped
    return tm, n_row, tl_in, tl_out, n_lane, needs_mask


def _avg_pool_rows(x2, kernel_size):
    """AvgPool1d over the last dim of a 2-D (R, L) array via a single pallas_call."""
    R, L = x2.shape
    L_out = L // kernel_size
    dtype = x2.dtype
    itemsize = dtype.itemsize
    tm, n_row, tl_in, tl_out, n_lane, needs_mask = _select_tiling(
        R, L, L_out, kernel_size, itemsize)

    pool_mat = _pool_matrix(tl_in, tl_out, kernel_size, dtype)
    kernel = _make_kernel(1.0 / kernel_size, tl_in, L_out * kernel_size, needs_mask)

    return pl.pallas_call(
        kernel,
        out_shape=jax.ShapeDtypeStruct((R, L_out), dtype),
        grid=(n_row, n_lane),
        in_specs=[
            # Input tile: rows x (pooled-cols * kernel_size).  Tail columns that AvgPool1d
            # discards are never mapped to an in-bounds output column.
            pl.BlockSpec((tm, tl_in), lambda i, j: (i, j)),
            # Constant pooling matrix: same block at every grid step -> fetched once.
            pl.BlockSpec((tl_in, tl_out), lambda i, j: (0, 0)),
        ],
        out_specs=pl.BlockSpec((tm, tl_out), lambda i, j: (i, j)),
        compiler_params=pltpu.CompilerParams(
            dimension_semantics=("parallel", "parallel")),
        cost_estimate=pl.CostEstimate(
            flops=2 * R * L_out * kernel_size,
            transcendentals=0,
            bytes_accessed=itemsize * (R * L + R * L_out + tl_in * tl_out)),
    )(x2, pool_mat)


def _compute_dtype(dtype):
    # TPU handles f32/bf16/f16 natively; anything else (e.g. f64) is computed in f32.
    return dtype if dtype in (jnp.float32, jnp.bfloat16, jnp.float16) else jnp.float32


def pooling_forward(x, kernel_size):
    """JAX/Pallas equivalent of Pooling(kernel_size).forward(x)."""
    orig_shape = x.shape
    lead = orig_shape[:-1]
    L = orig_shape[-1]
    L_out = L // kernel_size
    R = math.prod(lead)
    out_dtype = x.dtype

    if L_out == 0 or R == 0:
        # torch.nn.AvgPool1d raises when L < kernel_size; return an empty result instead.
        return jnp.zeros(lead + (L_out,), dtype=out_dtype)

    if jnp.issubdtype(x.dtype, jnp.complexfloating):
        # Fuse the complex case into one pallas_call: real/imag become extra rows of a
        # single 2-D problem (one launch instead of two, one extraction pass instead of
        # two).  An interleaved-float bitcast view would avoid even that pass, but the
        # stacked-rows form is portable and keeps the kernel identical to the real path.
        parts = jnp.stack([jnp.real(x), jnp.imag(x)], axis=0)      # (2, *lead, L)
        cdt = _compute_dtype(parts.dtype)
        x2 = parts.astype(cdt).reshape(2 * R, L)
        y2 = _avg_pool_rows(x2, kernel_size).reshape((2,) + lead + (L_out,))
        return jax.lax.complex(y2[0], y2[1]).astype(out_dtype)

    cdt = _compute_dtype(x.dtype)
    x2 = x.astype(cdt).reshape(R, L)
    y2 = _avg_pool_rows(x2, kernel_size)
    return y2.reshape(lead + (L_out,)).astype(out_dtype)


def _reference(x, kernel_size):
    """Pure-jnp reference matching torch.nn.AvgPool1d + the module's view glue."""
    lead = x.shape[:-1]
    L = x.shape[-1]
    L_out = L // kernel_size
    xt = x[..., : L_out * kernel_size].reshape(lead + (L_out, kernel_size))
    return xt.mean(axis=-1)


if __name__ == "__main__":
    key = jax.random.PRNGKey(0)
    k1, k2, k3, k4, k5 = jax.random.split(key, 5)
    kernel_size = 4

    # 1) Real 4-D input (single-tile path): (2, 4, 3, 16) -> (2, 4, 3, 4)
    x_real = jax.random.normal(k1, (2, 4, 3, 16), dtype=jnp.float32)
    y_real = jax.block_until_ready(pooling_forward(x_real, kernel_size))
    assert y_real.shape == (2, 4, 3, 4), y_real.shape
    assert jnp.allclose(y_real, _reference(x_real, kernel_size), atol=1e-5, rtol=1e-5)

    # 2) Complex64 input, one fused launch: (2, 4, 16) -> (2, 4, 4) complex64
    x_c = (jax.random.normal(k2, (2, 4, 16), dtype=jnp.float32)
           + 1j * jax.random.normal(k3, (2, 4, 16), dtype=jnp.float32)).astype(jnp.complex64)
    y_c = jax.block_until_ready(pooling_forward(x_c, kernel_size))
    assert y_c.shape == (2, 4, 4) and y_c.dtype == jnp.complex64
    assert jnp.allclose(y_c, _reference(x_c, kernel_size), atol=1e-5, rtol=1e-5)

    # 3) Length not divisible by kernel_size (AvgPool1d drops the tail): (2, 5, 18) -> (2, 5, 4)
    x_trim = jax.random.normal(k4, (2, 5, 18), dtype=jnp.float32)
    y_trim = jax.block_until_ready(pooling_forward(x_trim, kernel_size))
    assert y_trim.shape == (2, 5, 4), y_trim.shape
    assert jnp.allclose(y_trim, _reference(x_trim, kernel_size), atol=1e-5, rtol=1e-5)

    # 4) Long rows: exercises the lane-tiled (multi-step grid) path incl. the masked edge tile.
    x_long = jax.random.normal(k5, (2, 2, 4736), dtype=jnp.float32)
    y_long = jax.block_until_ready(pooling_forward(x_long, kernel_size))
    assert y_long.shape == (2, 2, 1184), y_long.shape
    assert jnp.allclose(y_long, _reference(x_long, kernel_size), atol=1e-5, rtol=1e-5)

    print("KERNEL_OK")
</pallas_src>

<mosaic_0001>
module attributes {stable_mosaic.version = 11 : i64} {
  func.func @kernel(%arg0: i32, %arg1: i32, %arg2: memref<24x16xf32, #tpu.memory_space<vmem>>, %arg3: memref<16x4xf32, #tpu.memory_space<vmem>>, %arg4: memref<24x4xf32, #tpu.memory_space<vmem>>) attributes {dimension_semantics = [#tpu.dimension_semantics<parallel>, #tpu.dimension_semantics<parallel>], iteration_bounds = array<i64: 1, 1>, scalar_prefetch = 0 : i64, scratch_operands = 0 : i64, tpu.core_type = #tpu.core_type<tc>, window_params = [{transform_indices = @transform_0, window_bounds = array<i64: 24, 16>}, {pipeline_mode = #tpu.pipeline_mode<synchronous>, transform_indices = @transform_1, window_bounds = array<i64: 16, 4>}, {transform_indices = @transform_2, window_bounds = array<i64: 24, 4>}]} {
    %c0 = arith.constant 0 : index
    %c0_0 = arith.constant 0 : index
    %0 = vector.load %arg2[%c0, %c0_0] : memref<24x16xf32, #tpu.memory_space<vmem>>, vector<24x16xf32>
    %c0_1 = arith.constant 0 : index
    %c0_2 = arith.constant 0 : index
    %1 = vector.load %arg3[%c0_1, %c0_2] : memref<16x4xf32, #tpu.memory_space<vmem>>, vector<16x4xf32>
    %cst = arith.constant dense<0.000000e+00> : vector<24x4xf32>
    %2 = tpu.matmul %0, %1, %cst {dimension_numbers = #tpu.dot_dimension_numbers<[1], [0], [0], [1], [0, 0, 1, 1], [], []>} : vector<24x16xf32>, vector<16x4xf32>, vector<24x4xf32> -> vector<24x4xf32>
    %cst_3 = arith.constant 2.500000e-01 : f32
    %3 = vector.broadcast %cst_3 : f32 to vector<24x4xf32>
    %4 = arith.mulf %2, %3 : vector<24x4xf32>
    %c0_4 = arith.constant 0 : index
    %c0_5 = arith.constant 0 : index
    %5 = vector.load %arg4[%c0_4, %c0_5] : memref<24x4xf32, #tpu.memory_space<vmem>>, vector<24x4xf32>
    tpu.vector_store %arg4[%c0_4, %c0_5], %4 {strides = array<i32>} : memref<24x4xf32, #tpu.memory_space<vmem>>, vector<24x4xf32>,
    return
  }
  func.func @transform_0(%arg0: i32, %arg1: i32) -> (i32, i32) {
    %c0_i32 = arith.constant 0 : i32
    return %arg0, %arg1 : i32, i32
  }
  func.func @transform_1(%arg0: i32, %arg1: i32) -> (i32, i32) {
    %c0_i32 = arith.constant 0 : i32
    %c0_i32_0 = arith.constant 0 : i32
    %c0_i32_1 = arith.constant 0 : i32
    return %c0_i32, %c0_i32_0 : i32, i32
  }
  func.func @transform_2(%arg0: i32, %arg1: i32) -> (i32, i32) {
    %c0_i32 = arith.constant 0 : i32
    return %arg0, %arg1 : i32, i32
  }
}

</mosaic_0001>

<bundles_post_ra>
// kernel: tpu_custom_call.1
= control target key start
LH: loop header
LB: loop body
LE: loop exit
PB: predicated region body
PF: predicated region fallthrough
CT: control target
= control target key end

     0   :  { %v144_v0 = vmov 0.0   ;;  %vm16_vm0 = vcmask 130048   ;;  %vm145_vm1 = vmmov 0   ;;  %vm109_vm2 = vcmask 31744   ;;  %s185_s1 = inlined_call_operand.vmem [shape: f32[16,4], index: 1, kind: input, shape index: {}]   ;;  %s186_s0 = inlined_call_operand.vmem [shape: f32[24,16], index: 0, kind: input, shape index: {}]   ;;  %s187_s2 = inlined_call_operand.vmem [shape: f32[24,4], index: 2, kind: output, shape index: {}]  }
   0x1   :  { %138 = vmatprep.subr.mxu1 %v144_v0  ;;  %v15_v1 = vld [vmem:[%s185_s1 + $0x8] sm:$0xff]  ;;  %125 = vmatprep.subr.mxu0 %v144_v0  ;;  %v14_v2 = vld [vmem:[%s185_s1] sm:$0xff]  ;;  %v13_v5 = vld [vmem:[%s186_s0 + $0x10] sm:$0xff] }
   0x2   :  { %140 = vmatpush3.msra.mxu1 %v15_v1  ;;  %126 = vmatpush3.msra.mxu0 %v15_v1  ;;  %v12_v3 = vld [vmem:[%s186_s0 + $0x8] sm:$0xff]  ;;  %v11_v4 = vld [vmem:[%s186_s0] sm:$0xff] }
   0x3   :  { %139 = vmatprep.subr.mxu1 %v144_v0  ;;  %132 = vmatprep.mubr.msk.f32.mxu1 %vm145_vm1, %v144_v0 }
   0x4   :  { %141 = vmatpush3.msra.mxu1 %v14_v2  ;;  %127 = vmatprep.subr.mxu0 %v144_v0 }
   0x5   :  { %133 = vmatmul.mubr.msk.f32.vlgmr.msra.gmra.mxu1 %vm16_vm0, %v12_v3  ;;  %128 = vmatpush3.msra.mxu0 %v14_v2 }
   0x6   :  { %129 = vmatprep.mubr.msk.f32.mxu0 %vm145_vm1, %v144_v0  ;;  %135 = vmatprep.mubr.msk.f32.mxu1 %vm145_vm1, %v144_v0 }
   0x7   :  { %130 = vmatmul.mubr.msk.f32.vlgmr.msra.gmra.mxu0 %vm16_vm0, %v11_v4 }
   0x9   :  { %136 = vmatmul.mubr.msk.f32.gmra.mxu1 %vm16_vm0, %v13_v5 }
  0xc5   :  { %v97_v6 = vpop.f32.mrf.mxu1 }
  0xc6   :  { %v107_v7 = vmul.f32 0.25, %v97_v6 }
  0xc7   :  { %v92_v8 = vpop.f32.mrf.mxu0  ;;  %v134_v9 = vpop.f32.mrf.mxu1 }
  0xc8   :  { %111 = vst.msk [vmem:[%s187_s2 + $0x8] sm:$0xff] %vm109_vm2, %v107_v7  ;;  %v106_v10 = vmul.f32 0.25, %v92_v8 }
  0xc9   :  { %v131_v11 = vpop.f32.mrf.mxu0  ;;  %v102_v12 = vpop.f32.mrf.mxu1 }
  0xca   :  { %110 = vst.msk [vmem:[%s187_s2] sm:$0xff] %vm109_vm2, %v106_v10  ;;  %v108_v13 = vmul.f32 0.25, %v102_v12 }
  0xcb   :  { %v137_v14 = vpop.f32.mrf.mxu1 }
  0xcc   :  { %112 = vst.msk [vmem:[%s187_s2 + $0x10] sm:$0xff] %vm109_vm2, %v108_v13 }

</bundles_post_ra>
